<compile_context>
chip_gen: v7x
topology: tpu7x:2x2x1
jax: 0.10.0
libtpu: 0.0.40
codegen_flags: <defaults>
</compile_context>

<pallas_src>
import functools

import jax
import jax.numpy as jnp
from jax.experimental import pallas as pl
from jax.experimental.pallas import tpu as pltpu


_NEG_INF = -1e30                     # finite "minus infinity" (no NaN hazard)
_VMEM_LIMIT = 64 * 1024 * 1024       # explicit scoped-VMEM grant (<= v7x physical 64 MiB)


def _layernorm(x, gamma, beta, eps=1e-5):
    mu = jnp.mean(x, axis=-1, keepdims=True)
    var = jnp.mean((x - mu) ** 2, axis=-1, keepdims=True)
    return (x - mu) * jax.lax.rsqrt(var + eps) * gamma + beta


# ---------------------------------------------------------------------------------------
# Kernel 1: fused Q/K/V projection (the two-sided 1/sqrt(hidden) scaling is folded into Wq).
# ---------------------------------------------------------------------------------------
def _qkv_kernel(x_ref, wqkv_ref, q_ref, k_ref, v_ref, *, hh):
    y = jnp.dot(x_ref[0].astype(jnp.bfloat16), wqkv_ref[...],
                preferred_element_type=jnp.float32)               # (tq, 3*hh) f32
    q_ref[0] = y[:, :hh].astype(q_ref.dtype)
    k_ref[0] = y[:, hh:2 * hh].astype(k_ref.dtype)
    v_ref[0] = y[:, 2 * hh:].astype(v_ref.dtype)


# ---------------------------------------------------------------------------------------
# Kernel 2: banded local attention + unify + residual + LayerNorm1.
# Grid = (batch, query_tile, key_tile_in_band); online softmax across the band.
# ---------------------------------------------------------------------------------------
def _attn_kernel(q_ref, k_ref, v_ref, x_ref,
                 wu_ref, bu_ref, g1_ref, b1_ref,
                 o_ref,
                 m_scr, l_scr, acc_scr,
                 *, heads, hidden, local_context):
    qi = pl.program_id(1)
    ki = pl.program_id(2)
    nkt = pl.num_programs(2)
    tq = q_ref.shape[1]

    # ------------- init: first key tile of this query tile ------------------------------
    @pl.when(ki == 0)
    def _():
        m_scr[...] = jnp.full_like(m_scr, _NEG_INF)
        l_scr[...] = jnp.zeros_like(l_scr)
        acc_scr[...] = jnp.zeros_like(acc_scr)

    kblock = qi - (nkt - 1) + ki           # logical key-tile index (< 0 -> skipped)
    d = (nkt - 1) - ki                     # == qi - kblock
    # Only the diagonal tile (d == 0) and tiles straddling the band's lower edge need the
    # mask; tiles fully inside the band (d >= 1 and d*tq + tq-1 <= local_context) do not.
    needs_mask = jnp.logical_or(d == 0, d * tq + (tq - 1) > local_context)
    valid = kblock >= 0

    def band_step(masked):
        q_all = q_ref[0]                   # (tq, hh) bf16, already 1/hidden-scaled
        k_all = k_ref[0]                   # (tq, hh) bf16
        v_all = v_ref[0]                   # (tq, hh) bf16
        acc_prev = acc_scr[...]            # one full-lane load per band step
        if masked:
            i_pos = qi * tq + jax.lax.broadcasted_iota(jnp.int32, (tq, tq), 0)
            j_pos = kblock * tq + jax.lax.broadcasted_iota(jnp.int32, (tq, tq), 1)
            diff = i_pos - j_pos
            mask = jnp.logical_and(diff >= 0, diff <= local_context)
        for h in range(heads):             # static unroll (small head count)
            lo, hi = h * hidden, (h + 1) * hidden
            s = jax.lax.dot_general(       # q_h @ k_h^T without materializing a transpose
                q_all[:, lo:hi], k_all[:, lo:hi],
                dimension_numbers=(((1,), (1,)), ((), ())),
                preferred_element_type=jnp.float32)           # (tq, tq) f32
            if masked:
                s = jnp.where(mask, s, _NEG_INF)
            m_prev = m_scr[h]
            m_new = jnp.maximum(m_prev, jnp.max(s, axis=-1, keepdims=True))
            alpha = jnp.exp(m_prev - m_new)
            p = jnp.exp(s - m_new)
            if masked:
                p = jnp.where(mask, p, 0.0)   # robust even for fully-masked rows
            l_scr[h] = alpha * l_scr[h] + jnp.sum(p, axis=-1, keepdims=True)
            acc_scr[:, lo:hi] = alpha * acc_prev[:, lo:hi] + jnp.dot(
                p.astype(jnp.bfloat16), v_all[:, lo:hi],
                preferred_element_type=jnp.float32)
            m_scr[h] = m_new

    @pl.when(jnp.logical_and(valid, needs_mask))
    def _():
        band_step(True)

    @pl.when(jnp.logical_and(valid, jnp.logical_not(needs_mask)))
    def _():
        band_step(False)

    # ------------- finalize: unify + residual + LayerNorm1 ------------------------------
    @pl.when(ki == nkt - 1)
    def _():
        accf = acc_scr[...]
        for h in range(heads):             # in-place softmax normalization (no ctx scratch)
            lo, hi = h * hidden, (h + 1) * hidden
            acc_scr[:, lo:hi] = accf[:, lo:hi] * pl.reciprocal(l_scr[h], approx=True)
        att = jnp.dot(acc_scr[...].astype(jnp.bfloat16), wu_ref[...],
                      preferred_element_type=jnp.float32) + bu_ref[0]
        x1 = _layernorm(att + x_ref[0].astype(jnp.float32), g1_ref[0], b1_ref[0])
        o_ref[0] = x1.astype(o_ref.dtype)


# ---------------------------------------------------------------------------------------
# Kernel 3: feed-forward + residual + LayerNorm2.
# ---------------------------------------------------------------------------------------
def _ffn_kernel(x1_ref, wf1_ref, bf1_ref, wf2_ref, bf2_ref, g2_ref, b2_ref, o_ref):
    x1 = x1_ref[0].astype(jnp.float32)
    hf = jnp.dot(x1.astype(jnp.bfloat16), wf1_ref[...],
                 preferred_element_type=jnp.float32) + bf1_ref[0]
    hf = jnp.maximum(hf, 0.0)
    ff = jnp.dot(hf.astype(jnp.bfloat16), wf2_ref[...],
                 preferred_element_type=jnp.float32) + bf2_ref[0]
    o_ref[0] = _layernorm(ff + x1, g2_ref[0], b2_ref[0]).astype(o_ref.dtype)


# ---------------------------------------------------------------------------------------
# Wrapper
# ---------------------------------------------------------------------------------------
def local_block(x, params, *, heads, hidden, local_context, tq=None):
    wq, wk, wv, wu, bu, g1, b1, wf1, bf1, wf2, bf2, g2, b2 = params
    bs, n, emb = x.shape
    hh = heads * hidden

    # Query tile. 128 keeps output stores lane-dense; on v6e with local_context >= 256,
    # tq=256 fills the 256-wide MXU better; on v7x (64 MiB VMEM) keep 128.
    if tq is None:
        tq = 128 if n % 128 == 0 else n
    assert n % tq == 0 and (tq % 8 == 0 or tq == n), "query tile must tile the sequence"
    nq = n // tq
    nkt = max(min(1 + (local_context + tq - 1) // tq, nq), 1)   # key tiles covering the band

    # Fold the two-sided 1/sqrt(hidden) scaling into Wq and fuse the three projection
    # weights into one (emb, 3*hh) matrix -> a single K=emb matmul per sequence tile.
    wqkv = jnp.concatenate([wq * (1.0 / float(hidden)), wk, wv],
                           axis=1).astype(jnp.bfloat16)
    wu_b = wu.astype(jnp.bfloat16)
    wf1_b = wf1.astype(jnp.bfloat16)
    wf2_b = wf2.astype(jnp.bfloat16)

    cparams2 = pltpu.CompilerParams(dimension_semantics=("parallel", "parallel"),
                                    vmem_limit_bytes=_VMEM_LIMIT)

    # ---- 1) Q/K/V projection, computed once for the whole sequence, stored bf16 --------
    q, k, v = pl.pallas_call(
        functools.partial(_qkv_kernel, hh=hh),
        out_shape=[jax.ShapeDtypeStruct((bs, n, hh), jnp.bfloat16)] * 3,
        grid=(bs, nq),
        in_specs=[pl.BlockSpec((1, tq, emb), lambda b, i: (b, i, 0)),
                  pl.BlockSpec((emb, 3 * hh), lambda b, i: (0, 0))],
        out_specs=[pl.BlockSpec((1, tq, hh), lambda b, i: (b, i, 0))] * 3,
        compiler_params=cparams2,
    )(x, wqkv)

    # ---- 2) banded attention + unify + residual + LayerNorm1 ---------------------------
    def const3(arr):
        nd = arr.ndim
        return pl.BlockSpec(arr.shape, lambda bb, qq, kk, _nd=nd: (0,) * _nd)

    band = nkt - 1
    q_spec = pl.BlockSpec((1, tq, hh), lambda b, qi, ki: (b, qi, 0))
    # key/value tile of the band; clamped at 0, out-of-range tiles are skipped in-kernel
    kv_spec = pl.BlockSpec((1, tq, hh),
                           lambda b, qi, ki, _s=band: (b, jnp.maximum(qi - _s + ki, 0), 0))
    x_spec = pl.BlockSpec((1, tq, emb), lambda b, qi, ki: (b, qi, 0))

    attn_cost = pl.CostEstimate(
        flops=int(4 * bs * nq * nkt * tq * tq * hh + 2 * bs * n * hh * emb),
        transcendentals=int(bs * nq * nkt * heads * tq * (tq + 1)),
        bytes_accessed=int(bs * n * hh * 2                    # q (bf16)
                           + 2 * bs * nq * nkt * tq * hh * 2  # k, v band re-reads (bf16)
                           + 2 * bs * n * emb * 4             # x in, x1 out (f32)
                           + hh * emb * 2 + 4 * emb * 4))     # weights / vectors

    x1 = pl.pallas_call(
        functools.partial(_attn_kernel, heads=heads, hidden=hidden,
                          local_context=local_context),
        out_shape=jax.ShapeDtypeStruct((bs, n, emb), jnp.float32),
        grid=(bs, nq, nkt),
        in_specs=[q_spec, kv_spec, kv_spec, x_spec,
                  const3(wu_b), const3(bu), const3(g1), const3(b1)],
        out_specs=pl.BlockSpec((1, tq, emb), lambda b, qi, ki: (b, qi, 0)),
        scratch_shapes=[pltpu.VMEM((heads, tq, 1), jnp.float32),   # running max
                        pltpu.VMEM((heads, tq, 1), jnp.float32),   # running denominator
                        pltpu.VMEM((tq, hh), jnp.float32)],        # running numerator
        compiler_params=pltpu.CompilerParams(
            dimension_semantics=("parallel", "parallel", "arbitrary"),
            vmem_limit_bytes=_VMEM_LIMIT),
        cost_estimate=attn_cost,
    )(q, k, v, x, wu_b, bu, g1, b1)

    # ---- 3) FFN + residual + LayerNorm2 -------------------------------------------------
    def const2(arr):
        nd = arr.ndim
        return pl.BlockSpec(arr.shape, lambda bb, ii, _nd=nd: (0,) * _nd)

    out = pl.pallas_call(
        _ffn_kernel,
        out_shape=jax.ShapeDtypeStruct((bs, n, emb), x.dtype),
        grid=(bs, nq),
        in_specs=[pl.BlockSpec((1, tq, emb), lambda b, i: (b, i, 0)),
                  const2(wf1_b), const2(bf1), const2(wf2_b), const2(bf2),
                  const2(g2), const2(b2)],
        out_specs=pl.BlockSpec((1, tq, emb), lambda b, i: (b, i, 0)),
        compiler_params=cparams2,
    )(x1, wf1_b, bf1, wf2_b, bf2, g2, b2)

    return out


# ---------------------------------------------------------------------------------------
# Pure-JAX f32 reference mirroring the PyTorch forward, and parameter init.
# ---------------------------------------------------------------------------------------
def local_block_reference(x, params, *, heads, hidden, local_context):
    wq, wk, wv, wu, bu, g1, b1, wf1, bf1, wf2, bf2, g2, b2 = params
    bs, n, emb = x.shape
    s = 1.0 / jnp.sqrt(jnp.float32(hidden))
    q = (x @ wq).reshape(bs, n, heads, hidden).transpose(0, 2, 1, 3) * s
    k = (x @ wk).reshape(bs, n, heads, hidden).transpose(0, 2, 1, 3) * s
    v = (x @ wv).reshape(bs, n, heads, hidden).transpose(0, 2, 1, 3)
    dot = jnp.einsum('bhqd,bhkd->bhqk', q, k)
    i = jnp.arange(n)[:, None]
    j = jnp.arange(n)[None, :]
    diff = i - j
    mask = (diff >= 0) & (diff <= local_context)
    dot = jnp.where(mask[None, None], dot, -jnp.inf)
    p = jax.nn.softmax(dot, axis=-1)
    ctx = jnp.einsum('bhqk,bhkd->bhqd', p, v).transpose(0, 2, 1, 3).reshape(bs, n, heads * hidden)
    att = ctx @ wu + bu[0]

    def ln(y, g, b):
        mu = y.mean(-1, keepdims=True)
        var = ((y - mu) ** 2).mean(-1, keepdims=True)
        return (y - mu) / jnp.sqrt(var + 1e-5) * g[0] + b[0]

    x1 = ln(att + x, g1, b1)
    ff = jnp.maximum(x1 @ wf1 + bf1[0], 0.0) @ wf2 + bf2[0]
    return ln(ff + x1, g2, b2)


def init_params(key, emb, hidden, heads, ff_hidden_mult):
    hh = heads * hidden
    ffd = ff_hidden_mult * emb
    ks = jax.random.split(key, 8)
    scale = 0.05
    wq = scale * jax.random.normal(ks[0], (emb, hh), jnp.float32)
    wk = scale * jax.random.normal(ks[1], (emb, hh), jnp.float32)
    wv = scale * jax.random.normal(ks[2], (emb, hh), jnp.float32)
    wu = scale * jax.random.normal(ks[3], (hh, emb), jnp.float32)
    bu = scale * jax.random.normal(ks[4], (1, emb), jnp.float32)
    g1 = jnp.ones((1, emb), jnp.float32)
    b1 = jnp.zeros((1, emb), jnp.float32)
    wf1 = scale * jax.random.normal(ks[5], (emb, ffd), jnp.float32)
    bf1 = scale * jax.random.normal(ks[6], (1, ffd), jnp.float32)
    wf2 = scale * jax.random.normal(ks[7], (ffd, emb), jnp.float32)
    bf2 = jnp.zeros((1, emb), jnp.float32)
    g2 = jnp.ones((1, emb), jnp.float32)
    b2 = jnp.zeros((1, emb), jnp.float32)
    return (wq, wk, wv, wu, bu, g1, b1, wf1, bf1, wf2, bf2, g2, b2)


if __name__ == "__main__":
    # Small config consistent with the module: emb=32, hidden=8, heads=4, ff_mult=4.
    # n=64, tq=8, local_context=16 exercises: clamped (kblock<0) early tiles, masked
    # band-edge and diagonal tiles, AND fully-inside (mask-free fast path) key tiles.
    bs, n, emb = 2, 64, 32
    heads, hidden, ff_hidden_mult, local_context = 4, 8, 4, 16

    key = jax.random.PRNGKey(0)
    kx, kp = jax.random.split(key)
    x = jax.random.normal(kx, (bs, n, emb), jnp.float32)
    params = init_params(kp, emb, hidden, heads, ff_hidden_mult)

    out = local_block(x, params, heads=heads, hidden=hidden,
                      local_context=local_context, tq=8)
    out = jax.block_until_ready(out)

    ref = local_block_reference(x, params, heads=heads, hidden=hidden,
                                local_context=local_context)
    assert out.shape == (bs, n, emb)
    max_err = float(jnp.max(jnp.abs(out - ref)))
    # bf16 matmul operands (f32 accumulate) vs a pure-f32 reference -> bf16-level tolerance
    assert jnp.allclose(out, ref, rtol=2e-2, atol=2e-2), f"mismatch vs reference: {max_err}"

    print("KERNEL_OK")
</pallas_src>

<mosaic_0001>
module attributes {stable_mosaic.version = 11 : i64} {
  func.func @_qkv_kernel(%arg0: i32, %arg1: i32, %arg2: memref<1x8x32xf32, #tpu.memory_space<vmem>>, %arg3: memref<32x96xbf16, #tpu.memory_space<vmem>>, %arg4: memref<1x8x32xbf16, #tpu.memory_space<vmem>>, %arg5: memref<1x8x32xbf16, #tpu.memory_space<vmem>>, %arg6: memref<1x8x32xbf16, #tpu.memory_space<vmem>>) attributes {dimension_semantics = [#tpu.dimension_semantics<parallel>, #tpu.dimension_semantics<parallel>], iteration_bounds = array<i64: 2, 8>, scalar_prefetch = 0 : i64, scratch_operands = 0 : i64, tpu.core_type = #tpu.core_type<tc>, window_params = [{transform_indices = @transform_0, window_bounds = array<i64: 1, 8, 32>}, {pipeline_mode = #tpu.pipeline_mode<synchronous>, transform_indices = @transform_1, window_bounds = array<i64: 32, 96>}, {transform_indices = @transform_2, window_bounds = array<i64: 1, 8, 32>}, {transform_indices = @transform_3, window_bounds = array<i64: 1, 8, 32>}, {transform_indices = @transform_4, window_bounds = array<i64: 1, 8, 32>}]} {
    %c0 = arith.constant 0 : index
    %c0_0 = arith.constant 0 : index
    %c0_1 = arith.constant 0 : index
    %0 = vector.load %arg2[%c0, %c0_0, %c0_1] : memref<1x8x32xf32, #tpu.memory_space<vmem>>, vector<1x8x32xf32>
    %1 = vector.shape_cast %0 : vector<1x8x32xf32> to vector<8x32xf32>
    %2 = arith.truncf %1 : vector<8x32xf32> to vector<8x32xbf16>
    %c0_2 = arith.constant 0 : index
    %c0_3 = arith.constant 0 : index
    %3 = vector.load %arg3[%c0_2, %c0_3] : memref<32x96xbf16, #tpu.memory_space<vmem>>, vector<32x96xbf16>
    %cst = arith.constant dense<0.000000e+00> : vector<8x96xf32>
    %4 = tpu.matmul %2, %3, %cst {dimension_numbers = #tpu.dot_dimension_numbers<[1], [0], [0], [1], [0, 0, 1, 1], [], []>} : vector<8x32xbf16>, vector<32x96xbf16>, vector<8x96xf32> -> vector<8x96xf32>
    %5 = vector.extract_strided_slice %4 {offsets = [0, 0], sizes = [8, 32], strides = [1, 1]} : vector<8x96xf32> to vector<8x32xf32>
    %6 = arith.truncf %5 : vector<8x32xf32> to vector<8x32xbf16>
    %c0_4 = arith.constant 0 : index
    %c0_5 = arith.constant 0 : index
    %c0_6 = arith.constant 0 : index
    %7 = vector.load %arg4[%c0_4, %c0_5, %c0_6] : memref<1x8x32xbf16, #tpu.memory_space<vmem>>, vector<1x8x32xbf16>
    %8 = vector.shape_cast %7 : vector<1x8x32xbf16> to vector<8x32xbf16>
    %9 = vector.shape_cast %6 : vector<8x32xbf16> to vector<1x8x32xbf16>
    tpu.vector_store %arg4[%c0_4, %c0_5, %c0_6], %9 {strides = array<i32>} : memref<1x8x32xbf16, #tpu.memory_space<vmem>>, vector<1x8x32xbf16>,
    %10 = vector.extract_strided_slice %4 {offsets = [0, 32], sizes = [8, 32], strides = [1, 1]} : vector<8x96xf32> to vector<8x32xf32>
    %11 = arith.truncf %10 : vector<8x32xf32> to vector<8x32xbf16>
    %c0_7 = arith.constant 0 : index
    %c0_8 = arith.constant 0 : index
    %c0_9 = arith.constant 0 : index
    %12 = vector.load %arg5[%c0_7, %c0_8, %c0_9] : memref<1x8x32xbf16, #tpu.memory_space<vmem>>, vector<1x8x32xbf16>
    %13 = vector.shape_cast %12 : vector<1x8x32xbf16> to vector<8x32xbf16>
    %14 = vector.shape_cast %11 : vector<8x32xbf16> to vector<1x8x32xbf16>
    tpu.vector_store %arg5[%c0_7, %c0_8, %c0_9], %14 {strides = array<i32>} : memref<1x8x32xbf16, #tpu.memory_space<vmem>>, vector<1x8x32xbf16>,
    %15 = vector.extract_strided_slice %4 {offsets = [0, 64], sizes = [8, 32], strides = [1, 1]} : vector<8x96xf32> to vector<8x32xf32>
    %16 = arith.truncf %15 : vector<8x32xf32> to vector<8x32xbf16>
    %c0_10 = arith.constant 0 : index
    %c0_11 = arith.constant 0 : index
    %c0_12 = arith.constant 0 : index
    %17 = vector.load %arg6[%c0_10, %c0_11, %c0_12] : memref<1x8x32xbf16, #tpu.memory_space<vmem>>, vector<1x8x32xbf16>
    %18 = vector.shape_cast %17 : vector<1x8x32xbf16> to vector<8x32xbf16>
    %19 = vector.shape_cast %16 : vector<8x32xbf16> to vector<1x8x32xbf16>
    tpu.vector_store %arg6[%c0_10, %c0_11, %c0_12], %19 {strides = array<i32>} : memref<1x8x32xbf16, #tpu.memory_space<vmem>>, vector<1x8x32xbf16>,
    return
  }
  func.func @transform_0(%arg0: i32, %arg1: i32) -> (i32, i32, i32) {
    %c0_i32 = arith.constant 0 : i32
    %c0_i32_0 = arith.constant 0 : i32
    return %arg0, %arg1, %c0_i32 : i32, i32, i32
  }
  func.func @transform_1(%arg0: i32, %arg1: i32) -> (i32, i32) {
    %c0_i32 = arith.constant 0 : i32
    %c0_i32_0 = arith.constant 0 : i32
    %c0_i32_1 = arith.constant 0 : i32
    return %c0_i32, %c0_i32_0 : i32, i32
  }
  func.func @transform_2(%arg0: i32, %arg1: i32) -> (i32, i32, i32) {
    %c0_i32 = arith.constant 0 : i32
    %c0_i32_0 = arith.constant 0 : i32
    return %arg0, %arg1, %c0_i32 : i32, i32, i32
  }
  func.func @transform_3(%arg0: i32, %arg1: i32) -> (i32, i32, i32) {
    %c0_i32 = arith.constant 0 : i32
    %c0_i32_0 = arith.constant 0 : i32
    return %arg0, %arg1, %c0_i32 : i32, i32, i32
  }
  func.func @transform_4(%arg0: i32, %arg1: i32) -> (i32, i32, i32) {
    %c0_i32 = arith.constant 0 : i32
    %c0_i32_0 = arith.constant 0 : i32
    return %arg0, %arg1, %c0_i32 : i32, i32, i32
  }
}

</mosaic_0001>

<bundles_post_ra>
// kernel: tpu_custom_call.1
= control target key start
LH: loop header
LB: loop body
LE: loop exit
PB: predicated region body
PF: predicated region fallthrough
CT: control target
= control target key end

     0   :  { %s1287_s0 = inlined_call_operand.hbm [shape: f32[2,64,32], index: 0, kind: input, shape index: {}]   ;;  %s1288_s1 = inlined_call_operand.hbm [shape: bf16[32,96], index: 1, kind: input, shape index: {}]   ;;  %s1289_s2 = inlined_call_operand.hbm [shape: bf16[2,64,32], index: 2, kind: output, shape index: {0}]   ;;  %s1290_s3 = inlined_call_operand.hbm [shape: bf16[2,64,32], index: 3, kind: output, shape index: {1}]   ;;  %s1291_s4 = inlined_call_operand.hbm [shape: bf16[2,64,32], index: 4, kind: output, shape index: {2}]  }
   0x1   :  { %1300 = sst [smem:[#allocation18_spill]] %s1288_s1 }
   0x2   :  { %1301 = sst [smem:[#allocation19_spill]] %s1291_s4 }
   0x3   :  { %10 = vsyncpa [#allocation3], 0 }
   0x4   :  { %12 = vsyncpa [#allocation3 + $0x1], 0 }
   0x5   :  { %13 = vsyncpa [#allocation6], 0 }
   0x6   :  { %14 = vsyncpa [#allocation4], 0 }
   0x7   :  { %16 = vsyncpa [#allocation4 + $0x1], 0 }
   0x8   :  { %17 = vsyncpa [#allocation9], 0 }
   0x9   :  { %19 = vsyncpa [#allocation9 + $0x1], 0  ;;  %s967_s15 = smov 0   ;;  %s969_s16 = smov 0  }
   0xa   :  { %s971_s17 = smov 0   ;;  %s973_s18 = smov 0  }
   0xb   :  { %s975_s19 = smov 0   ;;  %s977_s20 = smov 0  }
   0xc   :  { %s979_s21 = smov 0   ;;  %s981_s22 = smov 0  }
   0xd LB: > { %1302 = sst [smem:[#allocation15_spill]] %s901_s15  ;;  %s1008_s23 = sadd.s32 4294967295, %s929_s22   ;;  %s929_s22 = sphi %s981_s22, %s25_s22   ;;  %s925_s21 = sphi %s979_s21, %s1330_s21   ;;  %s921_s20 = sphi %s977_s20, %s1329_s20   ;;  %s917_s19 = sphi %s975_s19, %s1328_s19   ;;  %s913_s18 = sphi %s973_s18, %s1327_s18   ;;  %s909_s17 = sphi %s971_s17, %s1326_s17   ;;  %s905_s16 = sphi %s969_s16, %s1325_s16   ;;  %s901_s15 = sphi %s967_s15, %s1324_s15  }
   0xe   : > { %s1295_s24 = sadd.s32 4294967294, %s929_s22   ;;  %p59_p0 = scmp.ne.s32.totalorder %s905_s16, %s901_s15 }
   0xf   : > { %p1292_p1 = scmp.eq.s32.totalorder %s1008_s23, 0  ;;  %p112_p3 = scmp.eq.s32.totalorder %s1295_s24, 15 }
  0x10   : > { %p563_p5 = scmp.ge.s32.totalorder %s929_s22, 1  ;;  %p175_p7 = scmp.lt.s32.totalorder %s929_s22, 17 }
  0x11   : > { %p1019_p4 = por %p1292_p1, %p59_p0  ;;  %p1024_p6 = por %p112_p3, %p59_p0 }
  0x12   : > { %p1029_p8 = pnand %p563_p5, %p175_p7  ;;  %s931_s28 = smov [#allocation5]  }
  0x13   : > { %s1303_s25 = scalar_select %p1019_p4, 1, 0 }
  0x14   : > { %s1304_s26 = scalar_select %p1024_p6, 1, 0 }
  0x15   : > { %s1306_s27 = scalar_select %p1029_p8, 1, 0 }
  0x16   : > { %1305 = sst [smem:[#allocation16_spill]] %s1304_s26  ;;  %s187_s29 = sshll.u32 %s931_s28, 4  ;;  %s188_s29 = int_to_ptr.vmem [resolvable:$true] %s187_s29 }
  0x17   : > { %p614_p9 = pneg %p1029_p8  ;;  %s1308_s1 = sld [smem:[#allocation18_spill]] }
  0x19   : > { %p1037_p10 = pnand %p614_p9, %p1292_p1 }
  0x1b   : > { %p711_p12 = pneg %p1037_p10 }
  0x1d   : > { %s709_s7 = scalar_lea.hbm %s1308_s1, 256 }
  0x1e   : > { %p710_p11 = scmp.ne.s32.totalorder %s1308_s1, %s709_s7  ;;  %p716_p3 = scmp.lt.u32.totalorder %s709_s7, %s1308_s1 }
  0x20   : > { %p712_p13 = pnand %p711_p12, %p710_p11 }
  0x22   : > { %p713_p0 = pneg %p712_p13 }
  0x24   : > { %p718_p5 = pnand %p716_p3, %p713_p0 }
  0x26   : > { %721 = shalt.err (!%p718_p5)
}
  0x27   : > { %s722_s12 = scalar_lea.vmem %s188_s29, 256  ;;  %p730_p2 = scmp.lt.s32.totalorder %s188_s29, %s188_s29 }
  0x28   : > { %p723_p7 = scmp.ne.s32.totalorder %s188_s29, %s722_s12  ;;  %p731_p6 = scmp.lt.s32.totalorder %s722_s12, %s722_s12 }
  0x2a   : > { %p725_p9 = pnand %p723_p7, %p711_p12  ;;  %p732_p4 = por %p731_p6, %p730_p2 }
  0x2c   : > { %p726_p1 = pneg %p725_p9 }
  0x2e   : > { %p733_p8 = pnand %p732_p4, %p726_p1 }
  0x30   : > { %736 = shalt.err (!%p733_p8)
}
  0x31   : > { %s932_s13 = smov 64   ;;  %s933_s14 = smov 4  }
  0x32   : > { %617 = dma.hbm_to_vmem [thread:$0]  (!%p1037_p10), %s1308_s1, 256, %s188_s29, [#allocation6], %s932_s13, %s932_s13, %s933_s14  }
  0x33   : > { %s34_s6 = sadd.s32 1, %s921_s20  ;;  %s37_s7 = sadd.s32 1, %s925_s21 }
  0x34   : > { %p35_p1 = scmp.ge.s32.totalorder %s34_s6, 8  ;;  %s46_s8 = sadd.s32 1, %s909_s17 }
  0x35   : > { %p53_p2 = scmp.ne.s32.totalorder %s909_s17, %s905_s16  ;;  %p54_p4 = scmp.eq.s32.totalorder %s929_s22, 0 }
  0x36   : > { %s1332_s6 = smov (%p35_p1, %s34_s6), 0  ;;  %s1334_s7 = smov (!%p35_p1, %s37_s7), %s925_s21 }
  0x37   : > { %1309 = sst [smem:[#allocation17_spill]] %s1332_s6  ;;  %s42_s9 = ssub.s32 %s921_s20, %s1332_s6 }
  0x38   : > { %p39_p6 = scmp.ge.s32.totalorder %s1334_s7, 2  ;;  %p1310_p8 = scmp.eq.s32.totalorder %s1008_s23, 15 }
  0x39   : > { %p1074_p10 = por %p54_p4, %p53_p2  ;;  %p633_p12 = scmp.lt.s32.totalorder %s929_s22, 16 }
  0x3a   : > { %p1070_p11 = por %p1310_p8, %p53_p2  ;;  %s1336_s7 = smov (%p39_p6, %s1334_s7), 0 }
  0x3b   : > { %s201_s10 = sand.u32 1, %s909_s17   ;;  %s567_s11 = sshll.u32 %s925_s21, 3 }
  0x3c   : > { %s41_s12 = ssub.s32 %s925_s21, %s1336_s7  ;;  %s566_s14 = sshll.u32 %s201_s10, 3 }
  0x3d   : > { %s43_s13 = sor.u32 %s42_s9, %s41_s12  ;;  %s210_s28 = sadd.s32 %s921_s20, %s567_s11 }
  0x3e   : > { %p44_p13 = scmp.eq.s32.totalorder %s43_s13, 0  ;;  %s205_s5 = scalar_lea.vmem [#allocation2], %s566_s14 }
  0x3f   : > { %s214_s24 = sshll.u32 %s205_s5, 4  ;;  %s568_s6 = sshll.u32 %s210_s28, 7  ;;  %s1089_s24 = int_to_ptr.vmem [resolvable:$true] %s214_s24 }
  0x40   : > { %s1087_s1 = scalar_select %p44_p13, %s909_s17, %s46_s8  }
  0x41   : > { %s1094_s4 = scalar_lea.hbm %s1287_s0, %s568_s6  ;;  %p1100_p0 = pnand %p633_p12, %p1074_p10 }
  0x42   : > { %s202_s8 = scalar_lea.sflag [#allocation3], %s201_s10  ;;  %s737_s11 = scalar_lea.hbm %s1094_s4, 128 }
  0x43   : > { %p738_p3 = scmp.ne.s32.totalorder %s1094_s4, %s737_s11  ;;  %p739_p5 = pneg %p1100_p0 }
  0x44   : > { %s742_s6 = scalar_lea.hbm %s1287_s0, 2048  ;;  %p743_p1 = scmp.lt.u32.totalorder %s1094_s4, %s1287_s0 }
  0x45   : > { %p740_p7 = pnand %p739_p5, %p738_p3  ;;  %p744_p2 = scmp.lt.u32.totalorder %s742_s6, %s737_s11 }
  0x46   : > { %p746_p6 = scmp.lt.u32.totalorder %s737_s11, %s1094_s4 }
  0x47   : > { %p741_p9 = pneg %p740_p7  ;;  %p745_p4 = por %p744_p2, %p743_p1 }
  0x49   : > { %p747_p8 = por %p746_p6, %p745_p4 }
  0x4b   : > { %p748_p10 = pnand %p747_p8, %p741_p9 }
  0x4d   : > { %751 = shalt.err (!%p748_p10)
}
  0x4e   : > { %s752_s10 = scalar_lea.vmem %s1089_s24, 128  ;;  %s934_s13 = smov [#allocation2]  }
  0x4f   : > { %p753_p12 = scmp.ne.s32.totalorder %s1089_s24, %s752_s10  ;;  %s757_s14 = sshll.u32 %s934_s13, 4  ;;  %s758_s14 = int_to_ptr.vmem [resolvable:$false] %s757_s14 }
  0x50   : > { %s759_s28 = scalar_lea.vmem %s758_s14, 256  ;;  %p760_p7 = scmp.lt.s32.totalorder %s1089_s24, %s758_s14 }
  0x51   : > { %p755_p13 = pnand %p753_p12, %p739_p5  ;;  %p761_p1 = scmp.lt.s32.totalorder %s759_s28, %s752_s10 }
  0x53   : > { %p756_p3 = pneg %p755_p13  ;;  %p762_p2 = por %p761_p1, %p760_p7 }
  0x55   : > { %p763_p4 = pnand %p762_p2, %p756_p3 }
  0x57   : > { %766 = shalt.err (!%p763_p4)
}
  0x58   : > { %621 = dma.hbm_to_vmem [thread:$0]  (!%p1100_p0), %s1094_s4, 128, %s1089_s24, %s202_s8  }
  0x59   : > { %p1314_p9 = scmp.ne.s32.totalorder %s1306_s27, 0 }
  0x5a   : > { %s1132_s5 = sand.u32 (!%p1314_p9), 1, %s905_s16   ;;  %p1315_p5 = scmp.ne.s32.totalorder (!%p1314_p9), %s1303_s25, 0 }
  0x5b   : > { %223 = sbr.rel (%p1314_p9) target bundleno = 477 (0x1dd), region = 28  ;;  %s570_s11 = sshll.u32 (!%p1314_p9), %s1132_s5, 3 }
  0x5c   : > { %s226_s15 = scalar_lea.sflag (!%p1314_p9), [#allocation3], %s1132_s5  ;;  %s229_s26 = scalar_lea.vmem (!%p1314_p9), [#allocation2], %s570_s11 }
  0x62   : > { %884 = dma.done.wait (%p1315_p5), %s226_s15, 128  }
  0x63   : > { %886 = vsyncadd (%p1315_p5), %s226_s15, 4294967168  ;;  %p1316_p6 = scmp.eq.s32.totalorder %s1008_s23, 0 }
  0x65   : > { %888 = dma.done.wait (%p1316_p6), [#allocation6], 256   ;;  %p1317_p0 = pmov %p1316_p6 }
  0x66   : > { %v935_v0 = vmov 0.0   ;;  %vm936_vm0 = vmmov 0   ;;  %v707_v1 = vld [vmem:[#allocation5] sm:$0xff]   ;;  %v708_v2 = vld [vmem:[#allocation5 + $0x8] sm:$0xff]   ;;  %v269_v3 = vld [vmem:[%s229_s26] sm:$0xff]  ;;  %vm287_vm1 = vcmask 261120  }
  0x67   : > { %890 = vsyncadd (%p1317_p0), [#allocation6], 4294967040  ;;  %594 = vmatprep.subr.bf16.mxu0 %v935_v0  ;;  %598 = vmatprep.mubr.msk.bf16.mxu0 %vm936_vm0, %v935_v0  ;;  %v270_v4 = vpack.c.bf16 %v269_v3, %v269_v3  ;;  %s582_s4 = sshll.u32 %s917_s19, 3  ;;  %s1146_s24 = sshll.u32 %s1132_s5, 2  ;;  %vm332_vm2 = vcmask 257024  }
  0x68   : > { %595 = vmatpush3.bf16.msra.mxu0 %v707_v1  ;;  %s367_s25 = sadd.s32 %s913_s18, %s582_s4  ;;  %s253_s9 = scalar_lea.vmem [#allocation7], %s1146_s24 }
  0x69   : > { %596 = vmatprep.subr.bf16.mxu0 %v935_v0  ;;  %s1149_s27 = sshll.u32 %s367_s25, 6  ;;  %s371_s8 = sshll.u32 %s253_s9, 4  ;;  %s1158_s8 = int_to_ptr.vmem [resolvable:$true] %s371_s8 }
  0x6a   : > { %s1156_s12 = scalar_lea.hbm %s1289_s2, %s1149_s27  ;;  %s937_s18 = smov 96  }
  0x6b   : > { %s346_s19 = scalar_lea.sflag [#allocation4], %s1132_s5  ;;  %s767_s10 = scalar_lea.vmem %s1158_s8, 64 }
  0x6c   : > { %597 = vmatpush3.bf16.msra.mxu0 %v708_v2  ;;  %p768_p8 = scmp.ne.s32.totalorder %s1158_s8, %s767_s10  ;;  %s938_s13 = smov [#allocation7]  }
  0x6d   : > { %s771_s14 = sshll.u32 %s938_s13, 4  ;;  %s772_s14 = int_to_ptr.vmem [resolvable:$false] %s771_s14 }
  0x6e   : > { %p769_p10 = pnand %p768_p8, %p1070_p11  ;;  %s773_s28 = scalar_lea.vmem %s772_s14, 128 }
  0x6f   : > { %599 = vmatmul.mubr.msk.bf16.vlgmr.msra.gmra.mrb[0].mxu0 %vm287_vm1, %v270_v4  ;;  %p774_p13 = scmp.lt.s32.totalorder %s1158_s8, %s772_s14  ;;  %p775_p3 = scmp.lt.s32.totalorder %s773_s28, %s767_s10 }
  0x70   : > { %p770_p12 = pneg %p769_p10 }
  0x71   : > { %p776_p7 = por %p775_p3, %p774_p13 }
  0x73   : > { %p777_p1 = pnand %p776_p7, %p770_p12 }
 0x142   : > { %v325_v5 = vpop.f32.mrb[0].mxu0 }
 0x143   : > { %v331_v6 = vpack.c.bf16 %v325_v5, %v325_v5  ;;  %v600_v7 = vpop.f32.mrb[1].mxu0 }
 0x144   : > { %v328_v8 = vpop.f32.mrb[2].mxu0 }
 0x145   : > { %337 = vrot.lane.b32.xlu0 %v331_v6, %s937_s18  ;;  %v601_v9 = vpop.f32.mrb[3].mxu0  ;;  %333 = vst.msk [vmem:[%s253_s9] sm:$0xf] %vm332_vm2, %v331_v6 }
 0x146   : > { %780 = shalt.err (!%p777_p1)
}
 0x147   : > { %s781_s5 = scalar_lea.hbm %s1156_s12, 64  ;;  %s785_s26 = scalar_lea.hbm %s1289_s2, 1024 }
 0x148   : > { %p782_p2 = scmp.ne.s32.totalorder %s1156_s12, %s781_s5  ;;  %p786_p5 = scmp.lt.u32.totalorder %s1156_s12, %s1289_s2 }
 0x149   : > { %p787_p6 = scmp.lt.u32.totalorder %s785_s26, %s781_s5  ;;  %p789_p8 = scmp.lt.u32.totalorder %s781_s5, %s1156_s12 }
 0x14a   : > { %p783_p4 = pnand %p782_p2, %p1070_p11 }
 0x14b   : > { %p788_p0 = por %p787_p6, %p786_p5 }
 0x14c   : > { %p784_p9 = pneg %p783_p4 }
 0x14d   : > { %p790_p10 = por %p789_p8, %p788_p0 }
 0x14f   : > { %p791_p12 = pnand %p790_p10, %p784_p9 }
 0x151   : > { %794 = shalt.err (!%p791_p12)
}
 0x152   : > { %608 = dma.vmem_to_hbm [thread:$0]  (%p1070_p11), %s1158_s8, 64, %s1156_s12, %s346_s19  }
 0x153   : > { %s939_s9 = smov 64   ;;  %s350_s6 = sand.u32 1, %s1008_s23  }
 0x154   : > { %341 = vrot.lane.b32.xlu0 %v331_v6, %s939_s9  ;;  %s260_s29 = scalar_lea.vmem [#allocation8], %s1146_s24  ;;  %s1189_s14 = scalar_lea.hbm %s1290_s3, %s1149_s27 }
 0x155   : > { %s386_s18 = sshll.u32 %s260_s29, 4  ;;  %s267_s28 = scalar_lea.vmem [#allocation10], %s1146_s24  ;;  %s1191_s18 = int_to_ptr.vmem [resolvable:$true] %s386_s18 }
 0x156   : > { %s1196_s5 = sshll.u32 %s267_s28, 4  ;;  %s1199_s23 = scalar_lea.sflag [#allocation9], %s350_s6  ;;  %s1230_s5 = int_to_ptr.vmem [resolvable:$true] %s1196_s5 }
 0x157   : > { %s795_s8 = scalar_lea.vmem %s1191_s18, 64  ;;  %s940_s12 = smov [#allocation8]  }
 0x158   : > { %p796_p13 = scmp.ne.s32.totalorder %s1191_s18, %s795_s8  ;;  %s799_s19 = sshll.u32 %s940_s12, 4  ;;  %s800_s19 = int_to_ptr.vmem [resolvable:$false] %s799_s19 }
 0x159   : > { %s801_s11 = scalar_lea.vmem %s800_s19, 128  ;;  %p802_p1 = scmp.lt.s32.totalorder %s1191_s18, %s800_s19 }
 0x15a   : > { %p797_p3 = pnand %p796_p13, %p1070_p11  ;;  %p803_p2 = scmp.lt.s32.totalorder %s801_s11, %s795_s8 }
 0x15c   : > { %p798_p7 = pneg %p797_p3  ;;  %p804_p4 = por %p803_p2, %p802_p1 }
 0x15e   : > { %p805_p9 = pnand %p804_p4, %p798_p7 }
 0x1b7   : > { %v338_v10 = vpop.permute.xlu0 %337 }
 0x1b8   : > { %340 = vst.msk [vmem:[%s260_s29] sm:$0xf] %vm332_vm2, %v338_v10 }
 0x1b9   : > { %808 = shalt.err (!%p805_p9)
}
 0x1ba   : > { %s809_s15 = scalar_lea.hbm %s1189_s14, 64  ;;  %s813_s25 = scalar_lea.hbm %s1290_s3, 1024 }
 0x1bb   : > { %p810_p5 = scmp.ne.s32.totalorder %s1189_s14, %s809_s15  ;;  %p814_p8 = scmp.lt.u32.totalorder %s1189_s14, %s1290_s3 }
 0x1bc   : > { %p815_p10 = scmp.lt.u32.totalorder %s813_s25, %s809_s15  ;;  %p817_p13 = scmp.lt.u32.totalorder %s809_s15, %s1189_s14 }
 0x1bd   : > { %p811_p6 = pnand %p810_p5, %p1070_p11 }
 0x1be   : > { %p816_p12 = por %p815_p10, %p814_p8 }
 0x1bf   : > { %p812_p0 = pneg %p811_p6 }
 0x1c0   : > { %p818_p3 = por %p817_p13, %p816_p12 }
 0x1c2   : > { %p819_p7 = pnand %p818_p3, %p812_p0 }
 0x1c4   : > { %822 = shalt.err (!%p819_p7)
}
 0x1c5   : > { %609 = dma.vmem_to_hbm [thread:$0]  (%p1070_p11), %s1191_s18, 64, %s1189_s14, %s1199_s23  }
 0x1c6   : > { %s1318_s13 = sld [smem:[#allocation19_spill]]  ;;  %v342_v11 = vpop.permute.xlu0 %341  ;;  %s823_s12 = scalar_lea.vmem %s1230_s5, 64 }
 0x1c7   : > { %344 = vst.msk [vmem:[%s267_s28] sm:$0xf] %vm332_vm2, %v342_v11  ;;  %p824_p1 = scmp.ne.s32.totalorder %s1230_s5, %s823_s12  ;;  %s941_s18 = smov [#allocation10]  }
 0x1c8   : > { %s827_s14 = sshll.u32 %s941_s18, 4  ;;  %s828_s14 = int_to_ptr.vmem [resolvable:$false] %s827_s14 }
 0x1c9   : > { %p825_p2 = pnand %p824_p1, %p1070_p11  ;;  %s829_s19 = scalar_lea.vmem %s828_s14, 128 }
 0x1ca   : > { %p830_p9 = scmp.lt.s32.totalorder %s1230_s5, %s828_s14  ;;  %p831_p5 = scmp.lt.s32.totalorder %s829_s19, %s823_s12 }
 0x1cb   : > { %p826_p4 = pneg %p825_p2 }
 0x1cc   : > { %s1227_s8 = scalar_lea.hbm %s1318_s13, %s1149_s27  ;;  %p832_p6 = por %p831_p5, %p830_p9 }
 0x1ce   : > { %p833_p0 = pnand %p832_p6, %p826_p4 }
 0x1d0   : > { %836 = shalt.err (!%p833_p0)
}
 0x1d1   : > { %s837_s24 = scalar_lea.hbm %s1227_s8, 64  ;;  %s841_s11 = scalar_lea.hbm %s1318_s13, 1024 }
 0x1d2   : > { %p838_p8 = scmp.ne.s32.totalorder %s1227_s8, %s837_s24  ;;  %p842_p13 = scmp.lt.u32.totalorder %s1227_s8, %s1318_s13 }
 0x1d3   : > { %p843_p3 = scmp.lt.u32.totalorder %s841_s11, %s837_s24  ;;  %p845_p1 = scmp.lt.u32.totalorder %s837_s24, %s1227_s8 }
 0x1d4   : > { %p839_p10 = pnand %p838_p8, %p1070_p11 }
 0x1d5   : > { %p844_p7 = por %p843_p3, %p842_p13 }
 0x1d6   : > { %p840_p12 = pneg %p839_p10 }
 0x1d7   : > { %p846_p2 = por %p845_p1, %p844_p7 }
 0x1d9   : > { %p847_p4 = pnand %p846_p2, %p840_p12 }
 0x1db   : > { %850 = shalt.err (!%p847_p4)
}
 0x1dc   : > { %610 = dma.vmem_to_hbm [thread:$0]  (%p1070_p11), %s1230_s5, 64, %s1227_s8, %s1199_s23  }
 0x1dd PF: > { %s1319_s4 = sld [smem:[#allocation15_spill]]  ;;  %s1320_s25 = sld [smem:[#allocation16_spill]] }
 0x1de   : > { %p635_p9 = scmp.ge.s32.totalorder %s929_s22, 2 }
 0x1e3   : > { %s413_s9 = sand.u32 1, %s1319_s4   ;;  %p1321_p5 = scmp.ne.s32.totalorder %s1320_s25, 0 }
 0x1e4   : > { %s414_s6 = scalar_lea.sflag [#allocation4], %s413_s9 }
 0x1e5   : > { %p623_p6 = pnand %p635_p9, %p1321_p5 }
 0x1e7   : > { %892 = dma.done.wait (!%p623_p6), %s414_s6, 64  }
 0x1e8   : > { %894 = vsyncadd (!%p623_p6), %s414_s6, 4294967232  ;;  %s1322_s29 = sadd.s32 4294967294, %s929_s22  }
 0x1e9   : > { %s422_s10 = sand.u32 1, %s1322_s29  }
 0x1ea   : > { %s423_s12 = scalar_lea.sflag [#allocation9], %s422_s10 }
 0x1eb   : > { %896 = dma.done.wait (!%p623_p6), %s423_s12, 128  }
 0x1ec   : > { %898 = vsyncadd (!%p623_p6), %s423_s12, 4294967168  ;;  %s25_s22 = sadd.s32 1, %s929_s22   ;;  %s1323_s30 = sld [smem:[#allocation17_spill]] }
 0x1ed   : > { %p22_p11 = scmp.ge.s32.totalorder %s25_s22, 18   ;;  %s1324_s15 = smov %s905_s16 }
 0x1ee   : > { %s1325_s16 = smov %s909_s17  ;;  %s1326_s17 = smov %s1087_s1 }
 0x1ef   : > { %s1327_s18 = smov %s921_s20  ;;  %s1328_s19 = smov %s925_s21 }
 0x1f0   : > { %s1330_s21 = smov %s1336_s7  ;;  %24 = sbr.rel (!%p22_p11) target bundleno = 13 (0xd), region = 109 }
 0x1f2   : > { %s1329_s20 = smov %s1323_s30 }
 0x1f7   :  { %437 = vsyncpa [#allocation3], 1 }
 0x1f8   :  { %439 = vsyncpa [#allocation3 + $0x1], 1 }
 0x1f9   :  { %440 = vsyncpa [#allocation6], 1 }
 0x1fa   :  { %441 = vsyncpa [#allocation4], 1 }
 0x1fb   :  { %443 = vsyncpa [#allocation4 + $0x1], 1 }
 0x1fc   :  { %444 = vsyncpa [#allocation9], 1 }
 0x1fd   :  { %446 = vsyncpa [#allocation9 + $0x1], 1 }

</bundles_post_ra>
